<compile_context>
chip_gen: v6e
topology: v6e:2x2x1
jax: 0.10.0
libtpu: 0.0.40
codegen_flags: <defaults>
</compile_context>

<pallas_src>
import functools
import math

import jax
import jax.numpy as jnp
from jax.experimental import pallas as pl
from jax.experimental.pallas import tpu as pltpu


def _round_up(x: int, m: int) -> int:
    return ((x + m - 1) // m) * m


def _proj_kernel(x_ref, w_ref, o_ref, acc_ref):
    """One (tm, tn) output tile, accumulating over the K grid axis.

    x_ref: (tm, tk)   activation tile
    w_ref: (tn, tk)   weight tile in native (out_dim, in_dim) layout
    o_ref: (tm, tn)   output tile
    acc_ref: (tm, tn) f32 accumulator (persists across the K axis)
    """
    @pl.when(pl.program_id(2) == 0)
    def _():
        acc_ref[...] = jnp.zeros_like(acc_ref)

    # Contract the last dim of both operands: (tm, tk) x (tn, tk) -> (tm, tn).
    # This lowers to an MXU matmul with a transposed RHS, so the weight never
    # needs a separate HBM transpose pass.
    acc_ref[...] += jax.lax.dot_general(
        x_ref[...],
        w_ref[...],
        dimension_numbers=(((1,), (1,)), ((), ())),
        preferred_element_type=jnp.float32,
    )

    @pl.when(pl.program_id(2) == pl.num_programs(2) - 1)
    def _():
        o_ref[...] = acc_ref[...].astype(o_ref.dtype)


@functools.partial(jax.jit, static_argnames=("tm", "tn", "tk"))
def proj_forward(x, matrix, *, tm=256, tn=256, tk=512):
    """y = x @ matrix.T  (exactly F.linear(x, matrix), no bias).

    x:      (..., in_dim)
    matrix: (out_dim, in_dim)   (native PyTorch Linear weight layout)
    """
    *lead, in_dim = x.shape
    out_dim, in_dim_w = matrix.shape
    assert in_dim == in_dim_w, (in_dim, in_dim_w)

    m = math.prod(lead) if lead else 1
    x2d = x.reshape(m, in_dim)

    # Clamp tiles to the (alignment-rounded) problem size so small problems
    # don't allocate huge blocks, while big problems get large MXU-filling
    # tiles. Blocks stay (8, 128)-aligned via the padding below.
    tm = min(tm, _round_up(m, 8))
    tn = min(tn, _round_up(out_dim, 128))
    tk = min(tk, _round_up(in_dim, 128))

    m_p = _round_up(m, tm)
    n_p = _round_up(out_dim, tn)
    k_p = _round_up(in_dim, tk)

    # Zero-pad so every block (including the K tail) is fully valid: zeros in
    # the padded K region contribute nothing to the accumulator; padded M/N
    # rows/cols are sliced away after the kernel.
    if (m_p, k_p) != (m, in_dim):
        x2d = jnp.pad(x2d, ((0, m_p - m), (0, k_p - in_dim)))
    w = matrix
    if (n_p, k_p) != (out_dim, in_dim):
        w = jnp.pad(w, ((0, n_p - out_dim), (0, k_p - in_dim)))

    grid = (m_p // tm, n_p // tn, k_p // tk)

    itemsize = jnp.dtype(x.dtype).itemsize
    cost = pl.CostEstimate(
        flops=2 * m_p * n_p * k_p,
        transcendentals=0,
        bytes_accessed=(m_p * k_p + n_p * k_p + m_p * n_p) * itemsize,
    )

    y2d = pl.pallas_call(
        _proj_kernel,
        out_shape=jax.ShapeDtypeStruct((m_p, n_p), x.dtype),
        grid_spec=pltpu.PrefetchScalarGridSpec(
            num_scalar_prefetch=0,
            grid=grid,
            in_specs=[
                # Activations: (tm, tk) tile at block (i, k).
                pl.BlockSpec((tm, tk), lambda i, j, k: (i, k)),
                # Weight in native (out_dim, in_dim) layout: (tn, tk) at (j, k).
                pl.BlockSpec((tn, tk), lambda i, j, k: (j, k)),
            ],
            out_specs=pl.BlockSpec((tm, tn), lambda i, j, k: (i, j)),
            scratch_shapes=[pltpu.VMEM((tm, tn), jnp.float32)],
        ),
        compiler_params=pltpu.CompilerParams(
            dimension_semantics=("parallel", "parallel", "arbitrary"),
        ),
        cost_estimate=cost,
    )(x2d, w)

    y2d = y2d[:m, :out_dim]
    return y2d.reshape(*lead, out_dim)


if __name__ == "__main__":
    # Small shapes consistent with a projection layer:
    # x: (batch=2, seq=8, in_dim=256) -> y: (2, 8, out_dim=128)
    batch, seq, in_dim, out_dim = 2, 8, 256, 128

    key = jax.random.PRNGKey(0)
    kx, kw = jax.random.split(key)
    x = jax.random.normal(kx, (batch, seq, in_dim), dtype=jnp.float32)
    # torch.empty() is uninitialized; initialize deterministically here.
    matrix = jax.random.normal(kw, (out_dim, in_dim), dtype=jnp.float32) * 0.02

    y = proj_forward(x, matrix)
    jax.block_until_ready(y)

    # Correctness check against plain-JAX reference of F.linear.
    y_ref = jnp.einsum("bsi,oi->bso", x, matrix)
    assert y.shape == (batch, seq, out_dim)
    assert jnp.allclose(y, y_ref, atol=1e-4, rtol=1e-4)

    # Also exercise a non-divisible K / odd-M path to verify tail handling.
    x2 = jax.random.normal(kx, (3, 5, 200), dtype=jnp.float32)
    w2 = jax.random.normal(kw, (96, 200), dtype=jnp.float32) * 0.02
    y2 = proj_forward(x2, w2)
    jax.block_until_ready(y2)
    y2_ref = jnp.einsum("bsi,oi->bso", x2, w2)
    assert jnp.allclose(y2, y2_ref, atol=1e-4, rtol=1e-4)

    print("KERNEL_OK")
</pallas_src>

<mosaic_0001>
module attributes {stable_mosaic.version = 11 : i64} {
  func.func @_proj_kernel(%arg0: i32, %arg1: i32, %arg2: i32, %arg3: memref<16x256xf32, #tpu.memory_space<vmem>>, %arg4: memref<128x256xf32, #tpu.memory_space<vmem>>, %arg5: memref<16x128xf32, #tpu.memory_space<vmem>>, %arg6: memref<16x128xf32, #tpu.memory_space<vmem>>) attributes {dimension_semantics = [#tpu.dimension_semantics<parallel>, #tpu.dimension_semantics<parallel>, #tpu.dimension_semantics<arbitrary>], iteration_bounds = array<i64: 1, 1, 1>, scalar_prefetch = 0 : i64, scratch_operands = 1 : i64, tpu.core_type = #tpu.core_type<tc>, window_params = [{transform_indices = @transform_0, window_bounds = array<i64: 16, 256>}, {transform_indices = @transform_1, window_bounds = array<i64: 128, 256>}, {transform_indices = @transform_2, window_bounds = array<i64: 16, 128>}]} {
    %c0_i32 = arith.constant 0 : i32
    %0 = arith.cmpi eq, %arg2, %c0_i32 : i32
    %1 = arith.extui %0 : i1 to i32
    %c0_i32_0 = arith.constant 0 : i32
    %2 = arith.cmpi ne, %1, %c0_i32_0 : i32
    scf.if %2 {
      %cst_10 = arith.constant 0.000000e+00 : f32
      %12 = vector.broadcast %cst_10 : f32 to vector<16x128xf32>
      %c0_11 = arith.constant 0 : index
      %c0_12 = arith.constant 0 : index
      %13 = vector.load %arg6[%c0_11, %c0_12] : memref<16x128xf32, #tpu.memory_space<vmem>>, vector<16x128xf32>
      tpu.vector_store %arg6[%c0_11, %c0_12], %12 {strides = array<i32>} : memref<16x128xf32, #tpu.memory_space<vmem>>, vector<16x128xf32>,
    } else {
    }
    %c0 = arith.constant 0 : index
    %c0_1 = arith.constant 0 : index
    %3 = vector.load %arg6[%c0, %c0_1] : memref<16x128xf32, #tpu.memory_space<vmem>>, vector<16x128xf32>
    %c0_2 = arith.constant 0 : index
    %c0_3 = arith.constant 0 : index
    %4 = vector.load %arg3[%c0_2, %c0_3] : memref<16x256xf32, #tpu.memory_space<vmem>>, vector<16x256xf32>
    %c0_4 = arith.constant 0 : index
    %c0_5 = arith.constant 0 : index
    %5 = vector.load %arg4[%c0_4, %c0_5] : memref<128x256xf32, #tpu.memory_space<vmem>>, vector<128x256xf32>
    %cst = arith.constant dense<0.000000e+00> : vector<16x128xf32>
    %6 = tpu.matmul %4, %5, %cst {dimension_numbers = #tpu.dot_dimension_numbers<[1], [1], [0], [0], [0, 0, 1, 0], [], []>} : vector<16x256xf32>, vector<128x256xf32>, vector<16x128xf32> -> vector<16x128xf32>
    %7 = arith.addf %3, %6 : vector<16x128xf32>
    %c0_6 = arith.constant 0 : index
    %c0_7 = arith.constant 0 : index
    %8 = vector.load %arg6[%c0_6, %c0_7] : memref<16x128xf32, #tpu.memory_space<vmem>>, vector<16x128xf32>
    tpu.vector_store %arg6[%c0_6, %c0_7], %7 {strides = array<i32>} : memref<16x128xf32, #tpu.memory_space<vmem>>, vector<16x128xf32>,
    %c0_i32_8 = arith.constant 0 : i32
    %9 = arith.cmpi eq, %arg2, %c0_i32_8 : i32
    %10 = arith.extui %9 : i1 to i32
    %c0_i32_9 = arith.constant 0 : i32
    %11 = arith.cmpi ne, %10, %c0_i32_9 : i32
    scf.if %11 {
      %c0_10 = arith.constant 0 : index
      %c0_11 = arith.constant 0 : index
      %12 = vector.load %arg6[%c0_10, %c0_11] : memref<16x128xf32, #tpu.memory_space<vmem>>, vector<16x128xf32>
      %c0_12 = arith.constant 0 : index
      %c0_13 = arith.constant 0 : index
      %13 = vector.load %arg5[%c0_12, %c0_13] : memref<16x128xf32, #tpu.memory_space<vmem>>, vector<16x128xf32>
      tpu.vector_store %arg5[%c0_12, %c0_13], %12 {strides = array<i32>} : memref<16x128xf32, #tpu.memory_space<vmem>>, vector<16x128xf32>,
    } else {
    }
    return
  }
  func.func @transform_0(%arg0: i32, %arg1: i32, %arg2: i32) -> (i32, i32) {
    %c0_i32 = arith.constant 0 : i32
    return %arg0, %arg2 : i32, i32
  }
  func.func @transform_1(%arg0: i32, %arg1: i32, %arg2: i32) -> (i32, i32) {
    %c0_i32 = arith.constant 0 : i32
    return %arg1, %arg2 : i32, i32
  }
  func.func @transform_2(%arg0: i32, %arg1: i32, %arg2: i32) -> (i32, i32) {
    %c0_i32 = arith.constant 0 : i32
    return %arg0, %arg1 : i32, i32
  }
}

</mosaic_0001>

<bundles_post_ra>
// kernel: proj_forward.1
= control target key start
LH: loop header
LB: loop body
LE: loop exit
PB: predicated region body
PF: predicated region fallthrough
CT: control target
= control target key end

     0   :  { %7 = vsyncpa [#allocation4], 0  ;;  %s324_s0 = inlined_call_operand.hbm [shape: f32[16,256], index: 0, kind: input, shape index: {}]   ;;  %s325_s1 = inlined_call_operand.hbm [shape: f32[128,256], index: 1, kind: input, shape index: {}]   ;;  %s326_s2 = inlined_call_operand.hbm [shape: f32[16,128], index: 2, kind: output, shape index: {}]  }
   0x1   :  { %8 = vsyncpa [#allocation7], 0 }
   0x2   :  { %9 = vsyncpa [#allocation5], 0  ;;  %s293_s9 = smov [#allocation3]  }
   0x3   :  { %s15_s10 = sshll.u32 %s293_s9, 4  ;;  %s16_s10 = int_to_ptr.vmem [resolvable:$true] %s15_s10 }
   0x4   :  { %s235_s11 = scalar_lea.vmem %s16_s10, 512  ;;  %p240_p1 = scmp.lt.s32.totalorder %s16_s10, %s16_s10 }
   0x5   :  { %p236_p0 = scmp.ne.s32.totalorder %s16_s10, %s235_s11  ;;  %p241_p2 = scmp.lt.s32.totalorder %s235_s11, %s235_s11 }
   0x7   :  { %p242_p3 = por %p241_p2, %p240_p1 }
   0x9   :  { %p243_p4 = pnand %p242_p3, %p236_p0 }
   0xb   :  { %246 = shalt.err (!%p243_p4)
}
   0xc   :  { %s294_s12 = smov 256   ;;  %s295_s13 = smov 16  }
   0xd   :  { %21 = dma.hbm_to_vmem [thread:$0]  %s324_s0, 512, %s16_s10, [#allocation4], %s294_s12, %s294_s12, %s295_s13  }
   0xe   :  { %s296_s16 = smov [#allocation6]  }
   0xf   :  { %s27_s17 = sshll.u32 %s296_s16, 4  ;;  %s28_s17 = int_to_ptr.vmem [resolvable:$true] %s27_s17 }
  0x10   :  { %s255_s18 = scalar_lea.vmem %s28_s17, 4096  ;;  %p260_p6 = scmp.lt.s32.totalorder %s28_s17, %s28_s17 }
  0x11   :  { %p256_p5 = scmp.ne.s32.totalorder %s28_s17, %s255_s18  ;;  %p261_p7 = scmp.lt.s32.totalorder %s255_s18, %s255_s18 }
  0x13   :  { %p262_p8 = por %p261_p7, %p260_p6 }
  0x15   :  { %p263_p9 = pnand %p262_p8, %p256_p5 }
  0x17   :  { %266 = shalt.err (!%p263_p9)
}
  0x18   :  { %33 = dma.hbm_to_vmem [thread:$0]  %s325_s1, 4096, %s28_s17, [#allocation7], %s294_s12, %s294_s12, %s295_s13  }
  0x19   :  { %287 = dma.done.wait [#allocation4], 512  }
  0x1a   :  { %288 = vsyncadd [#allocation4], 4294966784 }
  0x1b   :  { %289 = dma.done.wait [#allocation7], 4096  }
  0x1c   :  { %290 = vsyncadd [#allocation7], 4294963200  ;;  %v83_v0 = vld [vmem:[#allocation6 + $0xf8] sm:$0xff]  ;;  %v82_v1 = vld [vmem:[#allocation6 + $0xf0] sm:$0xff]  ;;  %s297_s0 = smov [#allocation8]  }
  0x1d   :  { %v81_v2 = vld [vmem:[#allocation6 + $0xe8] sm:$0xff]  ;;  %84 = vmatprep.subr.mxu0 %v83_v0  ;;  %188 = vmatprep.subr.mxu1 %v83_v0  ;;  %v80_v3 = vld [vmem:[#allocation6 + $0xe0] sm:$0xff]  ;;  %v79_v4 = vld [vmem:[#allocation6 + $0xd8] sm:$0xff]  ;;  %s175_s1 = sshll.u32 %s297_s0, 4  ;;  %s176_s1 = int_to_ptr.vmem [resolvable:$true] %s175_s1 }
  0x1e   :  { %85 = vmatpush1.xpose.msra.mxu0 %v82_v1  ;;  %204 = vmatpush1.xpose.msra.mxu1 %v82_v1  ;;  %v78_v5 = vld [vmem:[#allocation6 + $0xd0] sm:$0xff]  ;;  %v77_v6 = vld [vmem:[#allocation6 + $0xc8] sm:$0xff]  ;;  %v76_v8 = vld [vmem:[#allocation6 + $0xc0] sm:$0xff]  ;;  %s267_s21 = scalar_lea.vmem %s176_s1, 256  ;;  %p272_p11 = scmp.lt.s32.totalorder %s176_s1, %s176_s1 }
  0x1f   :  { %86 = vmatprep.subr.mxu0 %v81_v2  ;;  %189 = vmatprep.subr.mxu1 %v81_v2  ;;  %v49_v7 = vld [vmem:[#allocation3 + $0x8] sm:$0xff]  ;;  %v51_v9 = vld [vmem:[#allocation3 + $0x18] sm:$0xff]  ;;  %v74_v11 = vld [vmem:[#allocation6 + $0xb0] sm:$0xff]  ;;  %p268_p10 = scmp.ne.s32.totalorder %s176_s1, %s267_s21  ;;  %p273_p12 = scmp.lt.s32.totalorder %s267_s21, %s267_s21 }
  0x20   :  { %v75_v10 = vld [vmem:[#allocation6 + $0xb8] sm:$0xff]  ;;  %148 = vmatprep.mubr.f32.mxu0 %v49_v7  ;;  %153 = vmatprep.mubr.f32.mxu1 %v51_v9  ;;  %v73_v12 = vld [vmem:[#allocation6 + $0xa8] sm:$0xff]  ;;  %v72_v13 = vld [vmem:[#allocation6 + $0xa0] sm:$0xff] }
  0x21   :  { %v71_v14 = vld [vmem:[#allocation6 + $0x98] sm:$0xff]  ;;  %v70_v15 = vld [vmem:[#allocation6 + $0x90] sm:$0xff]  ;;  %v69_v16 = vld [vmem:[#allocation6 + $0x88] sm:$0xff]  ;;  %p274_p13 = por %p273_p12, %p272_p11 }
  0x22   :  { %87 = vmatpush1.xpose.msra.mxu0 %v80_v3  ;;  %205 = vmatpush1.xpose.msra.mxu1 %v80_v3  ;;  %v68_v17 = vld [vmem:[#allocation6 + $0x80] sm:$0xff]  ;;  %v67_v18 = vld [vmem:[#allocation6 + $0x78] sm:$0xff]  ;;  %v66_v19 = vld [vmem:[#allocation6 + $0x70] sm:$0xff] }
  0x23   :  { %88 = vmatprep.subr.mxu0 %v79_v4  ;;  %190 = vmatprep.subr.mxu1 %v79_v4  ;;  %v65_v20 = vld [vmem:[#allocation6 + $0x68] sm:$0xff]  ;;  %v64_v21 = vld [vmem:[#allocation6 + $0x60] sm:$0xff]  ;;  %v63_v22 = vld [vmem:[#allocation6 + $0x58] sm:$0xff]  ;;  %p275_p0 = pnand %p274_p13, %p268_p10 }
  0x24   :  { %v62_v23 = vld [vmem:[#allocation6 + $0x50] sm:$0xff]  ;;  %v61_v24 = vld [vmem:[#allocation6 + $0x48] sm:$0xff]  ;;  %v60_v25 = vld [vmem:[#allocation6 + $0x40] sm:$0xff] }
  0x25   :  { %v59_v26 = vld [vmem:[#allocation6 + $0x38] sm:$0xff]  ;;  %v58_v27 = vld [vmem:[#allocation6 + $0x30] sm:$0xff]  ;;  %v57_v28 = vld [vmem:[#allocation6 + $0x28] sm:$0xff] }
  0x26   :  { %89 = vmatpush1.xpose.msra.mxu0 %v78_v5  ;;  %206 = vmatpush1.xpose.msra.mxu1 %v78_v5  ;;  %v56_v29 = vld [vmem:[#allocation6 + $0x20] sm:$0xff]  ;;  %v55_v30 = vld [vmem:[#allocation6 + $0x18] sm:$0xff]  ;;  %v54_v31 = vld [vmem:[#allocation6 + $0x10] sm:$0xff] }
  0x27   :  { %90 = vmatprep.subr.mxu0 %v77_v6  ;;  %191 = vmatprep.subr.mxu1 %v77_v6  ;;  %v53_v32 = vld [vmem:[#allocation6 + $0x8] sm:$0xff]  ;;  %v52_v33 = vld [vmem:[#allocation6] sm:$0xff]  ;;  %v50_v35 = vld [vmem:[#allocation3 + $0x10] sm:$0xff] }
  0x28   :  { %v48_v34 = vld [vmem:[#allocation3] sm:$0xff] }
  0x2a   :  { %91 = vmatpush1.xpose.msra.mxu0 %v76_v8  ;;  %207 = vmatpush1.xpose.msra.mxu1 %v76_v8 }
  0x2b   :  { %92 = vmatprep.subr.mxu0 %v75_v10  ;;  %192 = vmatprep.subr.mxu1 %v75_v10 }
  0x2e   :  { %93 = vmatpush1.xpose.msra.mxu0 %v74_v11  ;;  %208 = vmatpush1.xpose.msra.mxu1 %v74_v11 }
  0x2f   :  { %94 = vmatprep.subr.mxu0 %v73_v12  ;;  %193 = vmatprep.subr.mxu1 %v73_v12 }
  0x32   :  { %95 = vmatpush1.xpose.msra.mxu0 %v72_v13  ;;  %209 = vmatpush1.xpose.msra.mxu1 %v72_v13 }
  0x33   :  { %96 = vmatprep.subr.mxu0 %v71_v14  ;;  %194 = vmatprep.subr.mxu1 %v71_v14 }
  0x36   :  { %97 = vmatpush1.xpose.msra.mxu0 %v70_v15  ;;  %210 = vmatpush1.xpose.msra.mxu1 %v70_v15 }
  0x37   :  { %98 = vmatprep.subr.mxu0 %v69_v16  ;;  %195 = vmatprep.subr.mxu1 %v69_v16 }
  0x3a   :  { %99 = vmatpush1.xpose.msra.mxu0 %v68_v17  ;;  %211 = vmatpush1.xpose.msra.mxu1 %v68_v17 }
  0x3b   :  { %100 = vmatprep.subr.mxu0 %v67_v18  ;;  %196 = vmatprep.subr.mxu1 %v67_v18 }
  0x3e   :  { %101 = vmatpush1.xpose.msra.mxu0 %v66_v19  ;;  %212 = vmatpush1.xpose.msra.mxu1 %v66_v19 }
  0x3f   :  { %102 = vmatprep.subr.mxu0 %v65_v20  ;;  %197 = vmatprep.subr.mxu1 %v65_v20 }
  0x42   :  { %103 = vmatpush1.xpose.msra.mxu0 %v64_v21  ;;  %213 = vmatpush1.xpose.msra.mxu1 %v64_v21 }
  0x43   :  { %104 = vmatprep.subr.mxu0 %v63_v22  ;;  %198 = vmatprep.subr.mxu1 %v63_v22 }
  0x46   :  { %105 = vmatpush1.xpose.msra.mxu0 %v62_v23  ;;  %214 = vmatpush1.xpose.msra.mxu1 %v62_v23 }
  0x47   :  { %106 = vmatprep.subr.mxu0 %v61_v24  ;;  %199 = vmatprep.subr.mxu1 %v61_v24 }
  0x4a   :  { %107 = vmatpush1.xpose.msra.mxu0 %v60_v25  ;;  %215 = vmatpush1.xpose.msra.mxu1 %v60_v25 }
  0x4b   :  { %108 = vmatprep.subr.mxu0 %v59_v26  ;;  %200 = vmatprep.subr.mxu1 %v59_v26 }
  0x4e   :  { %109 = vmatpush1.xpose.msra.mxu0 %v58_v27  ;;  %216 = vmatpush1.xpose.msra.mxu1 %v58_v27 }
  0x4f   :  { %110 = vmatprep.subr.mxu0 %v57_v28  ;;  %201 = vmatprep.subr.mxu1 %v57_v28 }
  0x52   :  { %111 = vmatpush1.xpose.msra.mxu0 %v56_v29  ;;  %217 = vmatpush1.xpose.msra.mxu1 %v56_v29 }
  0x53   :  { %112 = vmatprep.subr.mxu0 %v55_v30  ;;  %202 = vmatprep.subr.mxu1 %v55_v30 }
  0x56   :  { %113 = vmatpush1.xpose.msra.mxu0 %v54_v31  ;;  %218 = vmatpush1.xpose.msra.mxu1 %v54_v31 }
  0x57   :  { %114 = vmatprep.subr.mxu0 %v53_v32  ;;  %203 = vmatprep.subr.mxu1 %v53_v32 }
  0x5a   :  { %115 = vmatpush1.xpose.msra.mxu0 %v52_v33  ;;  %219 = vmatpush1.xpose.msra.mxu1 %v52_v33 }
  0x5d   :  { %149 = vmatmul.mubr.f32.vlgmr.msra.gmra.mxu0 %v48_v34  ;;  %154 = vmatmul.mubr.f32.vlgmr.msra.gmra.mxu1 %v50_v35 }
 0x11d   :  { %v150_v36 = vpop.f32.mrf.mxu0  ;;  %v155_v37 = vpop.f32.mrf.mxu1 }
 0x11e   :  { %168 = vst [vmem:[#allocation8] sm:$0xff] %v150_v36  ;;  %169 = vst [vmem:[#allocation8 + $0x8] sm:$0xff] %v155_v37 }
 0x11f   :  { %v152_v38 = vpop.f32.mrf.mxu0  ;;  %v157_v39 = vpop.f32.mrf.mxu1 }
 0x120   :  { %278 = shalt.err (!%p275_p0)
}
 0x121   :  { %s298_s22 = smov 128   ;;  %s299_s23 = smov 8  }
 0x122   :  { %181 = dma.vmem_to_hbm [thread:$0]  %s176_s1, 256, %s326_s2, [#allocation5], %s298_s22, %s298_s22, %s299_s23  }
 0x123   :  { %291 = dma.done.wait [#allocation5], 256  }
 0x124   :  { %292 = vsyncadd [#allocation5], 4294967040 }
 0x125   :  { %185 = vsyncpa [#allocation4], 1 }
 0x126   :  { %186 = vsyncpa [#allocation7], 1 }
 0x127   :  { %187 = vsyncpa [#allocation5], 1 }

</bundles_post_ra>
